<compile_context>
chip_gen: v7x
topology: tpu7x:2x2x1
jax: 0.10.0
libtpu: 0.0.40
codegen_flags: <defaults>
</compile_context>

<pallas_src>
from functools import partial

import jax
import jax.numpy as jnp
from jax.experimental import pallas as pl
from jax.experimental.pallas import tpu as pltpu

OBS_DIM = 32
ACT_DIM = 6
HID1 = 128
HID_GRU = 64
H_PAD = 128          # packed state slab width (hidden | action | zero pad)
LN_EPS = 1e-5


def _round_up(n, m):
    return (n + m - 1) // m * m


# ------------------------------- kernel --------------------------------------

def _policy_kernel(
    x_ref, slab_ref,
    w1_ref, b1_ref, w2_ref, b2_ref,
    wih_ref, bih_ref, whh_ref, bhh_ref,
    wout_ref, bout_ref,
    out_ref,
):
    x = x_ref[...]                                     # (TB, 32) f32

    # --- LayerNorm over obs_dim (two-pass biased variance; affine folded into fc1) ---
    mean = jnp.mean(x, axis=-1, keepdims=True)
    xc = x - mean
    var = jnp.mean(xc * xc, axis=-1, keepdims=True)
    xn = xc * jax.lax.rsqrt(var + LN_EPS)

    # --- fc1 + ReLU (bf16 operands, f32 accumulate) ---
    h1 = jnp.dot(xn.astype(jnp.bfloat16), w1_ref[...],
                 preferred_element_type=jnp.float32) + b1_ref[...]
    h1 = jnp.maximum(h1, 0.0)

    # --- fc2 + ReLU ---
    h2 = jnp.dot(h1.astype(jnp.bfloat16), w2_ref[...],
                 preferred_element_type=jnp.float32) + b2_ref[...]
    h2 = jnp.maximum(h2, 0.0)

    # --- single-step GRU cell (PyTorch gate order r, z, n; native 64-lane gates) ---
    h0 = slab_ref[:, :HID_GRU]                         # (TB, 64) f32 previous hidden
    gi = jnp.dot(h2.astype(jnp.bfloat16), wih_ref[...],
                 preferred_element_type=jnp.float32) + bih_ref[...]    # (TB, 192)
    gh = jnp.dot(h0.astype(jnp.bfloat16), whh_ref[...],
                 preferred_element_type=jnp.float32) + bhh_ref[...]    # (TB, 192)

    H = HID_GRU
    r = jax.nn.sigmoid(gi[:, :H] + gh[:, :H])
    z = jax.nn.sigmoid(gi[:, H:2 * H] + gh[:, H:2 * H])
    n = jnp.tanh(gi[:, 2 * H:] + r * gh[:, 2 * H:])
    h_new = n + z * (h0 - n)                           # (TB, 64) f32

    # --- output head; lands in slab lanes [64, 64+ACT_DIM), the rest stays exactly 0 ---
    act = jnp.dot(h_new.astype(jnp.bfloat16), wout_ref[...],
                  preferred_element_type=jnp.float32) + bout_ref[...]  # (TB, 64)

    out_ref[...] = jnp.concatenate([h_new, act], axis=-1).astype(out_ref.dtype)


# ------------------------------- wrappers -------------------------------------

def _batch_tiling(B):
    """(padded batch, batch tile).  Tiles are multiples of 8; when the batch allows it
    the grid has >= 2 tiles so the 'parallel' axis shards across both v7x cores.
    Tiles are capped at 1024 rows (VMEM-safe on all of v5e/v6e/v7x)."""
    Bp = _round_up(max(B, 1), 8)
    if Bp <= 8:
        return Bp, Bp
    if Bp % 16 == 0:
        TB = min(1024, Bp // 2)
    else:
        TB = min(1024, Bp)
    return _round_up(Bp, TB), TB


@partial(jax.jit, static_argnums=(3,), donate_argnums=(1,))
def _policy_step(x_p, slab, p, TB):
    Bp = x_p.shape[0]
    grid = (Bp // TB,)
    weights = (p["w1"], p["b1"], p["w2"], p["b2"],
               p["w_ih"], p["b_ih"], p["w_hh"], p["b_hh"],
               p["w_out"], p["b_out"])

    def row_spec(d):
        return pl.BlockSpec((TB, d), lambda i: (i, 0))

    def resident_spec(arr):
        return pl.BlockSpec(arr.shape, lambda i: (0, 0))

    return pl.pallas_call(
        _policy_kernel,
        out_shape=jax.ShapeDtypeStruct((Bp, H_PAD), jnp.float32),
        grid=grid,
        in_specs=[row_spec(OBS_DIM), row_spec(H_PAD)]
                 + [resident_spec(w) for w in weights],
        out_specs=row_spec(H_PAD),
        input_output_aliases={1: 0},        # state slab updated in place
        compiler_params=pltpu.CompilerParams(dimension_semantics=("parallel",)),
    )(x_p, slab, *weights)


def init_state(B):
    """Zero packed state slab (use this for the PyTorch h=None case)."""
    Bp, _ = _batch_tiling(B)
    return jnp.zeros((Bp, H_PAD), jnp.float32)


def pack_state(h, B):
    """Widen a (B, 64) / (1, B, 64) hidden state into the (Bp, 128) packed slab."""
    if h is None:
        return init_state(B)
    Bp, _ = _batch_tiling(B)
    h = jnp.asarray(h, jnp.float32).reshape(-1, HID_GRU)
    return jnp.zeros((Bp, H_PAD), jnp.float32).at[:h.shape[0], :HID_GRU].set(h)


def shared_policy_rnn_packed(x, slab, p):
    """Rollout-step API: x (B, 32) f32, slab (Bp, 128) f32 packed state (donated).
    Returns the new packed slab; hidden = slab[:B, :64], action = slab[:B, 64:64+6]."""
    B = x.shape[0]
    Bp, TB = _batch_tiling(B)
    x_p = x if B == Bp else jnp.zeros((Bp, OBS_DIM), x.dtype).at[:B].set(x)
    assert slab.shape == (Bp, H_PAD), (slab.shape, (Bp, H_PAD))
    return _policy_step(x_p, slab, p, TB)


def shared_policy_rnn(x, h, p):
    """PyTorch-compatible API: returns (action (B, act_dim), h_new (1, B, 64)).
    For multi-step rollouts prefer shared_policy_rnn_packed (keeps the state packed
    in HBM and avoids the per-step pad/unpack copies)."""
    B = x.shape[0]
    slab = pack_state(h, B)
    new_slab = shared_policy_rnn_packed(x, slab, p)
    act = new_slab[:B, HID_GRU:HID_GRU + ACT_DIM]
    h_new = new_slab[:B, :HID_GRU]
    return act, h_new[None, :, :]


# ----------------------------- parameters -------------------------------------

def init_params(key):
    """Logical f32 parameters (PyTorch layout, weights pre-transposed to (in, out))."""
    ks = jax.random.split(key, 12)
    s = 0.1
    return {
        "ln_g": 1.0 + s * jax.random.normal(ks[10], (1, OBS_DIM), jnp.float32),
        "ln_b": s * jax.random.normal(ks[11], (1, OBS_DIM), jnp.float32),
        "w1": s * jax.random.normal(ks[0], (OBS_DIM, HID1), jnp.float32),
        "b1": s * jax.random.normal(ks[1], (1, HID1), jnp.float32),
        "w2": s * jax.random.normal(ks[2], (HID1, HID1), jnp.float32),
        "b2": s * jax.random.normal(ks[3], (1, HID1), jnp.float32),
        # GRU weights in PyTorch (r, z, n) gate order, stored transposed (in, 3*hidden)
        "w_ih": s * jax.random.normal(ks[4], (HID1, 3 * HID_GRU), jnp.float32),
        "w_hh": s * jax.random.normal(ks[5], (HID_GRU, 3 * HID_GRU), jnp.float32),
        "b_ih": s * jax.random.normal(ks[6], (1, 3 * HID_GRU), jnp.float32),
        "b_hh": s * jax.random.normal(ks[7], (1, 3 * HID_GRU), jnp.float32),
        "w_out": s * jax.random.normal(ks[8], (HID_GRU, ACT_DIM), jnp.float32),
        "b_out": s * jax.random.normal(ks[9], (1, ACT_DIM), jnp.float32),
    }


def pack_params(p):
    """Repack logical params into the kernel layout:
       - LayerNorm affine folded into fc1 (W1' = diag(g)W1, b1' = b1 + b@W1)
       - bf16 matmul weights, f32 biases
       - GRU gates kept at native 64 lanes: W_ih (128, 192), W_hh (64, 192)
       - output head padded to (64, 64); columns [0, ACT_DIM) hold the real head and
         land at slab lanes [64, 64+ACT_DIM) after the in-kernel concat."""
    bf = jnp.bfloat16
    w1 = (p["w1"] * p["ln_g"].reshape(OBS_DIM, 1)).astype(bf)
    b1 = p["b1"] + p["ln_b"] @ p["w1"]
    w_out = jnp.zeros((HID_GRU, HID_GRU), jnp.float32).at[:, :ACT_DIM].set(p["w_out"])
    b_out = jnp.zeros((1, HID_GRU), jnp.float32).at[:, :ACT_DIM].set(p["b_out"])
    return {
        "w1": w1, "b1": b1,
        "w2": p["w2"].astype(bf), "b2": p["b2"],
        "w_ih": p["w_ih"].astype(bf), "b_ih": p["b_ih"],
        "w_hh": p["w_hh"].astype(bf), "b_hh": p["b_hh"],
        "w_out": w_out.astype(bf), "b_out": b_out,
    }


# ----------------------------- reference & test --------------------------------

def _reference(x, h, p):
    """Pure-JAX f32 reference of the PyTorch forward."""
    mean = jnp.mean(x, axis=-1, keepdims=True)
    var = jnp.mean((x - mean) ** 2, axis=-1, keepdims=True)
    xn = (x - mean) / jnp.sqrt(var + LN_EPS) * p["ln_g"] + p["ln_b"]
    h1 = jax.nn.relu(xn @ p["w1"] + p["b1"])
    h2 = jax.nn.relu(h1 @ p["w2"] + p["b2"])
    gi = h2 @ p["w_ih"] + p["b_ih"]
    gh = h @ p["w_hh"] + p["b_hh"]
    H = HID_GRU
    r = jax.nn.sigmoid(gi[:, :H] + gh[:, :H])
    z = jax.nn.sigmoid(gi[:, H:2 * H] + gh[:, H:2 * H])
    n = jnp.tanh(gi[:, 2 * H:] + r * gh[:, 2 * H:])
    h_new = (1.0 - z) * n + z * h
    return h_new @ p["w_out"] + p["b_out"], h_new[None, :, :]


if __name__ == "__main__":
    key = jax.random.PRNGKey(0)
    k_x, k_h, k_p = jax.random.split(key, 3)

    B, STEPS = 4, 3
    xs = jax.random.normal(k_x, (STEPS, B, OBS_DIM), jnp.float32)
    h0 = jax.random.normal(k_h, (B, HID_GRU), jnp.float32)
    logical = init_params(k_p)
    packed = pack_params(logical)

    # --- single step via the PyTorch-compatible API ---
    act, h_new = shared_policy_rnn(xs[0], h0, packed)
    jax.block_until_ready((act, h_new))
    ref_act, ref_h = _reference(xs[0], h0, logical)
    assert act.shape == (B, ACT_DIM) and h_new.shape == (1, B, HID_GRU)
    assert float(jnp.max(jnp.abs(act - ref_act))) < 5e-2, "action mismatch"
    assert float(jnp.max(jnp.abs(h_new - ref_h))) < 5e-2, "hidden-state mismatch"

    # --- multi-step rollout via the packed slab (in-place aliased state carry) ---
    slab = pack_state(h0, B)
    h_ref = h0
    for t in range(STEPS):
        slab = shared_policy_rnn_packed(xs[t], slab, packed)
        ref_act, ref_h = _reference(xs[t], h_ref, logical)
        h_ref = ref_h[0]
    jax.block_until_ready(slab)
    act_T = slab[:B, HID_GRU:HID_GRU + ACT_DIM]
    h_T = slab[:B, :HID_GRU]
    assert float(jnp.max(jnp.abs(act_T - ref_act))) < 5e-2, "rollout action mismatch"
    assert float(jnp.max(jnp.abs(h_T - h_ref))) < 5e-2, "rollout hidden mismatch"

    print("KERNEL_OK")
</pallas_src>

<mosaic_0001>
module attributes {stable_mosaic.version = 11 : i64} {
  func.func @_policy_kernel(%arg0: i32, %arg1: memref<8x32xf32, #tpu.memory_space<vmem>>, %arg2: memref<8x128xf32, #tpu.memory_space<vmem>>, %arg3: memref<32x128xbf16, #tpu.memory_space<vmem>>, %arg4: memref<1x128xf32, #tpu.memory_space<vmem>>, %arg5: memref<128x128xbf16, #tpu.memory_space<vmem>>, %arg6: memref<1x128xf32, #tpu.memory_space<vmem>>, %arg7: memref<128x192xbf16, #tpu.memory_space<vmem>>, %arg8: memref<1x192xf32, #tpu.memory_space<vmem>>, %arg9: memref<64x192xbf16, #tpu.memory_space<vmem>>, %arg10: memref<1x192xf32, #tpu.memory_space<vmem>>, %arg11: memref<64x64xbf16, #tpu.memory_space<vmem>>, %arg12: memref<1x64xf32, #tpu.memory_space<vmem>>, %arg13: memref<8x128xf32, #tpu.memory_space<vmem>>) attributes {dimension_semantics = [#tpu.dimension_semantics<parallel>], iteration_bounds = array<i64: 1>, scalar_prefetch = 0 : i64, scratch_operands = 0 : i64, tpu.core_type = #tpu.core_type<tc>, window_params = [{transform_indices = @transform_0, window_bounds = array<i64: 8, 32>}, {transform_indices = @transform_1, window_bounds = array<i64: 8, 128>}, {pipeline_mode = #tpu.pipeline_mode<synchronous>, transform_indices = @transform_2, window_bounds = array<i64: 32, 128>}, {pipeline_mode = #tpu.pipeline_mode<synchronous>, transform_indices = @transform_3, window_bounds = array<i64: 1, 128>}, {pipeline_mode = #tpu.pipeline_mode<synchronous>, transform_indices = @transform_4, window_bounds = array<i64: 128, 128>}, {pipeline_mode = #tpu.pipeline_mode<synchronous>, transform_indices = @transform_5, window_bounds = array<i64: 1, 128>}, {pipeline_mode = #tpu.pipeline_mode<synchronous>, transform_indices = @transform_6, window_bounds = array<i64: 128, 192>}, {pipeline_mode = #tpu.pipeline_mode<synchronous>, transform_indices = @transform_7, window_bounds = array<i64: 1, 192>}, {pipeline_mode = #tpu.pipeline_mode<synchronous>, transform_indices = @transform_8, window_bounds = array<i64: 64, 192>}, {pipeline_mode = #tpu.pipeline_mode<synchronous>, transform_indices = @transform_9, window_bounds = array<i64: 1, 192>}, {pipeline_mode = #tpu.pipeline_mode<synchronous>, transform_indices = @transform_10, window_bounds = array<i64: 64, 64>}, {pipeline_mode = #tpu.pipeline_mode<synchronous>, transform_indices = @transform_11, window_bounds = array<i64: 1, 64>}, {transform_indices = @transform_12, window_bounds = array<i64: 8, 128>}]} {
    %c0 = arith.constant 0 : index
    %c0_0 = arith.constant 0 : index
    %0 = vector.load %arg1[%c0, %c0_0] : memref<8x32xf32, #tpu.memory_space<vmem>>, vector<8x32xf32>
    %cst = arith.constant dense<0.000000e+00> : vector<8xf32>
    %1 = vector.multi_reduction <add>, %0, %cst [1] : vector<8x32xf32> to vector<8xf32>
    %2 = vector.shape_cast %1 : vector<8xf32> to vector<8x1xf32>
    %cst_1 = arith.constant 3.200000e+01 : f32
    %3 = vector.broadcast %cst_1 : f32 to vector<8x1xf32>
    %4 = arith.divf %2, %3 : vector<8x1xf32>
    %5 = vector.broadcast %4 : vector<8x1xf32> to vector<8x32xf32>
    %6 = arith.subf %0, %5 : vector<8x32xf32>
    %7 = arith.mulf %6, %6 : vector<8x32xf32>
    %cst_2 = arith.constant dense<0.000000e+00> : vector<8xf32>
    %8 = vector.multi_reduction <add>, %7, %cst_2 [1] : vector<8x32xf32> to vector<8xf32>
    %9 = vector.shape_cast %8 : vector<8xf32> to vector<8x1xf32>
    %cst_3 = arith.constant 3.200000e+01 : f32
    %10 = vector.broadcast %cst_3 : f32 to vector<8x1xf32>
    %11 = arith.divf %9, %10 : vector<8x1xf32>
    %cst_4 = arith.constant 9.99999974E-6 : f32
    %12 = vector.broadcast %cst_4 : f32 to vector<8x1xf32>
    %13 = arith.addf %11, %12 : vector<8x1xf32>
    %14 = math.rsqrt %13 : vector<8x1xf32>
    %15 = vector.broadcast %14 : vector<8x1xf32> to vector<8x32xf32>
    %16 = arith.mulf %6, %15 : vector<8x32xf32>
    %17 = arith.truncf %16 : vector<8x32xf32> to vector<8x32xbf16>
    %c0_5 = arith.constant 0 : index
    %c0_6 = arith.constant 0 : index
    %18 = vector.load %arg3[%c0_5, %c0_6] : memref<32x128xbf16, #tpu.memory_space<vmem>>, vector<32x128xbf16>
    %cst_7 = arith.constant dense<0.000000e+00> : vector<8x128xf32>
    %19 = tpu.matmul %17, %18, %cst_7 {dimension_numbers = #tpu.dot_dimension_numbers<[1], [0], [0], [1], [0, 0, 1, 1], [], []>} : vector<8x32xbf16>, vector<32x128xbf16>, vector<8x128xf32> -> vector<8x128xf32>
    %c0_8 = arith.constant 0 : index
    %c0_9 = arith.constant 0 : index
    %20 = vector.load %arg4[%c0_8, %c0_9] : memref<1x128xf32, #tpu.memory_space<vmem>>, vector<1x128xf32>
    %21 = vector.broadcast %20 : vector<1x128xf32> to vector<8x128xf32>
    %22 = arith.addf %19, %21 : vector<8x128xf32>
    %cst_10 = arith.constant 0.000000e+00 : f32
    %23 = vector.broadcast %cst_10 : f32 to vector<8x128xf32>
    %24 = arith.maximumf %22, %23 : vector<8x128xf32>
    %25 = arith.truncf %24 : vector<8x128xf32> to vector<8x128xbf16>
    %c0_11 = arith.constant 0 : index
    %c0_12 = arith.constant 0 : index
    %26 = vector.load %arg5[%c0_11, %c0_12] : memref<128x128xbf16, #tpu.memory_space<vmem>>, vector<128x128xbf16>
    %cst_13 = arith.constant dense<0.000000e+00> : vector<8x128xf32>
    %27 = tpu.matmul %25, %26, %cst_13 {dimension_numbers = #tpu.dot_dimension_numbers<[1], [0], [0], [1], [0, 0, 1, 1], [], []>} : vector<8x128xbf16>, vector<128x128xbf16>, vector<8x128xf32> -> vector<8x128xf32>
    %c0_14 = arith.constant 0 : index
    %c0_15 = arith.constant 0 : index
    %28 = vector.load %arg6[%c0_14, %c0_15] : memref<1x128xf32, #tpu.memory_space<vmem>>, vector<1x128xf32>
    %29 = vector.broadcast %28 : vector<1x128xf32> to vector<8x128xf32>
    %30 = arith.addf %27, %29 : vector<8x128xf32>
    %cst_16 = arith.constant 0.000000e+00 : f32
    %31 = vector.broadcast %cst_16 : f32 to vector<8x128xf32>
    %32 = arith.maximumf %30, %31 : vector<8x128xf32>
    %c0_17 = arith.constant 0 : index
    %c0_18 = arith.constant 0 : index
    %33 = vector.load %arg2[%c0_17, %c0_18] : memref<8x128xf32, #tpu.memory_space<vmem>>, vector<8x64xf32>
    %34 = arith.truncf %32 : vector<8x128xf32> to vector<8x128xbf16>
    %c0_19 = arith.constant 0 : index
    %c0_20 = arith.constant 0 : index
    %35 = vector.load %arg7[%c0_19, %c0_20] : memref<128x192xbf16, #tpu.memory_space<vmem>>, vector<128x192xbf16>
    %cst_21 = arith.constant dense<0.000000e+00> : vector<8x192xf32>
    %36 = tpu.matmul %34, %35, %cst_21 {dimension_numbers = #tpu.dot_dimension_numbers<[1], [0], [0], [1], [0, 0, 1, 1], [], []>} : vector<8x128xbf16>, vector<128x192xbf16>, vector<8x192xf32> -> vector<8x192xf32>
    %c0_22 = arith.constant 0 : index
    %c0_23 = arith.constant 0 : index
    %37 = vector.load %arg8[%c0_22, %c0_23] : memref<1x192xf32, #tpu.memory_space<vmem>>, vector<1x192xf32>
    %38 = vector.broadcast %37 : vector<1x192xf32> to vector<8x192xf32>
    %39 = arith.addf %36, %38 : vector<8x192xf32>
    %40 = arith.truncf %33 : vector<8x64xf32> to vector<8x64xbf16>
    %c0_24 = arith.constant 0 : index
    %c0_25 = arith.constant 0 : index
    %41 = vector.load %arg9[%c0_24, %c0_25] : memref<64x192xbf16, #tpu.memory_space<vmem>>, vector<64x192xbf16>
    %cst_26 = arith.constant dense<0.000000e+00> : vector<8x192xf32>
    %42 = tpu.matmul %40, %41, %cst_26 {dimension_numbers = #tpu.dot_dimension_numbers<[1], [0], [0], [1], [0, 0, 1, 1], [], []>} : vector<8x64xbf16>, vector<64x192xbf16>, vector<8x192xf32> -> vector<8x192xf32>
    %c0_27 = arith.constant 0 : index
    %c0_28 = arith.constant 0 : index
    %43 = vector.load %arg10[%c0_27, %c0_28] : memref<1x192xf32, #tpu.memory_space<vmem>>, vector<1x192xf32>
    %44 = vector.broadcast %43 : vector<1x192xf32> to vector<8x192xf32>
    %45 = arith.addf %42, %44 : vector<8x192xf32>
    %46 = vector.extract_strided_slice %39 {offsets = [0, 0], sizes = [8, 64], strides = [1, 1]} : vector<8x192xf32> to vector<8x64xf32>
    %47 = vector.extract_strided_slice %45 {offsets = [0, 0], sizes = [8, 64], strides = [1, 1]} : vector<8x192xf32> to vector<8x64xf32>
    %48 = arith.addf %46, %47 : vector<8x64xf32>
    %49 = arith.negf %48 : vector<8x64xf32>
    %50 = math.exp %49 : vector<8x64xf32>
    %cst_29 = arith.constant 1.000000e+00 : f32
    %51 = vector.broadcast %cst_29 : f32 to vector<8x64xf32>
    %52 = arith.addf %51, %50 : vector<8x64xf32>
    %53 = arith.divf %51, %52 : vector<8x64xf32>
    %54 = vector.extract_strided_slice %39 {offsets = [0, 64], sizes = [8, 64], strides = [1, 1]} : vector<8x192xf32> to vector<8x64xf32>
    %55 = vector.extract_strided_slice %45 {offsets = [0, 64], sizes = [8, 64], strides = [1, 1]} : vector<8x192xf32> to vector<8x64xf32>
    %56 = arith.addf %54, %55 : vector<8x64xf32>
    %57 = arith.negf %56 : vector<8x64xf32>
    %58 = math.exp %57 : vector<8x64xf32>
    %cst_30 = arith.constant 1.000000e+00 : f32
    %59 = vector.broadcast %cst_30 : f32 to vector<8x64xf32>
    %60 = arith.addf %59, %58 : vector<8x64xf32>
    %61 = arith.divf %59, %60 : vector<8x64xf32>
    %62 = vector.extract_strided_slice %39 {offsets = [0, 128], sizes = [8, 64], strides = [1, 1]} : vector<8x192xf32> to vector<8x64xf32>
    %63 = vector.extract_strided_slice %45 {offsets = [0, 128], sizes = [8, 64], strides = [1, 1]} : vector<8x192xf32> to vector<8x64xf32>
    %64 = arith.mulf %53, %63 : vector<8x64xf32>
    %65 = arith.addf %62, %64 : vector<8x64xf32>
    %66 = math.tanh %65 : vector<8x64xf32>
    %67 = arith.subf %33, %66 : vector<8x64xf32>
    %68 = arith.mulf %61, %67 : vector<8x64xf32>
    %69 = arith.addf %66, %68 : vector<8x64xf32>
    %70 = arith.truncf %69 : vector<8x64xf32> to vector<8x64xbf16>
    %c0_31 = arith.constant 0 : index
    %c0_32 = arith.constant 0 : index
    %71 = vector.load %arg11[%c0_31, %c0_32] : memref<64x64xbf16, #tpu.memory_space<vmem>>, vector<64x64xbf16>
    %cst_33 = arith.constant dense<0.000000e+00> : vector<8x64xf32>
    %72 = tpu.matmul %70, %71, %cst_33 {dimension_numbers = #tpu.dot_dimension_numbers<[1], [0], [0], [1], [0, 0, 1, 1], [], []>} : vector<8x64xbf16>, vector<64x64xbf16>, vector<8x64xf32> -> vector<8x64xf32>
    %c0_34 = arith.constant 0 : index
    %c0_35 = arith.constant 0 : index
    %73 = vector.load %arg12[%c0_34, %c0_35] : memref<1x64xf32, #tpu.memory_space<vmem>>, vector<1x64xf32>
    %74 = vector.broadcast %73 : vector<1x64xf32> to vector<8x64xf32>
    %75 = arith.addf %72, %74 : vector<8x64xf32>
    %76 = tpu.concatenate %69, %75 in 1 : vector<8x64xf32>, vector<8x64xf32> -> vector<8x128xf32>
    %c0_36 = arith.constant 0 : index
    %c0_37 = arith.constant 0 : index
    %77 = vector.load %arg13[%c0_36, %c0_37] : memref<8x128xf32, #tpu.memory_space<vmem>>, vector<8x128xf32>
    tpu.vector_store %arg13[%c0_36, %c0_37], %76 {strides = array<i32>} : memref<8x128xf32, #tpu.memory_space<vmem>>, vector<8x128xf32>,
    return
  }
  func.func @transform_0(%arg0: i32) -> (i32, i32) {
    %c0_i32 = arith.constant 0 : i32
    %c0_i32_0 = arith.constant 0 : i32
    return %arg0, %c0_i32 : i32, i32
  }
  func.func @transform_1(%arg0: i32) -> (i32, i32) {
    %c0_i32 = arith.constant 0 : i32
    %c0_i32_0 = arith.constant 0 : i32
    return %arg0, %c0_i32 : i32, i32
  }
  func.func @transform_2(%arg0: i32) -> (i32, i32) {
    %c0_i32 = arith.constant 0 : i32
    %c0_i32_0 = arith.constant 0 : i32
    %c0_i32_1 = arith.constant 0 : i32
    return %c0_i32, %c0_i32_0 : i32, i32
  }
  func.func @transform_3(%arg0: i32) -> (i32, i32) {
    %c0_i32 = arith.constant 0 : i32
    %c0_i32_0 = arith.constant 0 : i32
    %c0_i32_1 = arith.constant 0 : i32
    return %c0_i32, %c0_i32_0 : i32, i32
  }
  func.func @transform_4(%arg0: i32) -> (i32, i32) {
    %c0_i32 = arith.constant 0 : i32
    %c0_i32_0 = arith.constant 0 : i32
    %c0_i32_1 = arith.constant 0 : i32
    return %c0_i32, %c0_i32_0 : i32, i32
  }
  func.func @transform_5(%arg0: i32) -> (i32, i32) {
    %c0_i32 = arith.constant 0 : i32
    %c0_i32_0 = arith.constant 0 : i32
    %c0_i32_1 = arith.constant 0 : i32
    return %c0_i32, %c0_i32_0 : i32, i32
  }
  func.func @transform_6(%arg0: i32) -> (i32, i32) {
    %c0_i32 = arith.constant 0 : i32
    %c0_i32_0 = arith.constant 0 : i32
    %c0_i32_1 = arith.constant 0 : i32
    return %c0_i32, %c0_i32_0 : i32, i32
  }
  func.func @transform_7(%arg0: i32) -> (i32, i32) {
    %c0_i32 = arith.constant 0 : i32
    %c0_i32_0 = arith.constant 0 : i32
    %c0_i32_1 = arith.constant 0 : i32
    return %c0_i32, %c0_i32_0 : i32, i32
  }
  func.func @transform_8(%arg0: i32) -> (i32, i32) {
    %c0_i32 = arith.constant 0 : i32
    %c0_i32_0 = arith.constant 0 : i32
    %c0_i32_1 = arith.constant 0 : i32
    return %c0_i32, %c0_i32_0 : i32, i32
  }
  func.func @transform_9(%arg0: i32) -> (i32, i32) {
    %c0_i32 = arith.constant 0 : i32
    %c0_i32_0 = arith.constant 0 : i32
    %c0_i32_1 = arith.constant 0 : i32
    return %c0_i32, %c0_i32_0 : i32, i32
  }
  func.func @transform_10(%arg0: i32) -> (i32, i32) {
    %c0_i32 = arith.constant 0 : i32
    %c0_i32_0 = arith.constant 0 : i32
    %c0_i32_1 = arith.constant 0 : i32
    return %c0_i32, %c0_i32_0 : i32, i32
  }
  func.func @transform_11(%arg0: i32) -> (i32, i32) {
    %c0_i32 = arith.constant 0 : i32
    %c0_i32_0 = arith.constant 0 : i32
    %c0_i32_1 = arith.constant 0 : i32
    return %c0_i32, %c0_i32_0 : i32, i32
  }
  func.func @transform_12(%arg0: i32) -> (i32, i32) {
    %c0_i32 = arith.constant 0 : i32
    %c0_i32_0 = arith.constant 0 : i32
    return %arg0, %c0_i32 : i32, i32
  }
}

</mosaic_0001>

<bundles_post_ra>
// kernel: _policy_step.1
= control target key start
LH: loop header
LB: loop body
LE: loop exit
PB: predicated region body
PF: predicated region fallthrough
CT: control target
= control target key end

     0   :  { %17 = vsyncpa [#allocation3], 0  ;;  %s1106_s0 = inlined_call_operand.vmem [shape: f32[8,32], index: 0, kind: input, shape index: {}]   ;;  %s1107_s1 = inlined_call_operand.hbm [shape: f32[8,128], index: 1, kind: input, shape index: {}, may-alias: {1,12}]   ;;  %s1108_s2 = inlined_call_operand.vmem [shape: bf16[32,128], index: 2, kind: input, shape index: {}]   ;;  %s1109_s3 = inlined_call_operand.vmem [shape: f32[1,128], index: 3, kind: input, shape index: {}]   ;;  %s1110_s4 = inlined_call_operand.vmem [shape: bf16[128,128], index: 4, kind: input, shape index: {}]   ;;  %s1111_s5 = inlined_call_operand.vmem [shape: f32[1,128], index: 5, kind: input, shape index: {}]   ;;  %s1112_s6 = inlined_call_operand.vmem [shape: bf16[128,192], index: 6, kind: input, shape index: {}]   ;;  %s1113_s7 = inlined_call_operand.vmem [shape: f32[1,192], index: 7, kind: input, shape index: {}]   ;;  %s1114_s8 = inlined_call_operand.vmem [shape: bf16[64,192], index: 8, kind: input, shape index: {}]   ;;  %s1115_s9 = inlined_call_operand.vmem [shape: f32[1,192], index: 9, kind: input, shape index: {}]   ;;  %s1116_s10 = inlined_call_operand.vmem [shape: bf16[64,64], index: 10, kind: input, shape index: {}]   ;;  %s1117_s11 = inlined_call_operand.vmem [shape: f32[1,64], index: 11, kind: input, shape index: {}]   ;;  %s1118_s12 = inlined_call_operand.hbm [shape: f32[8,128], index: 12, kind: output, shape index: {}, may-alias: {1,12}]  }
   0x1   :  { %18 = vsyncpa [#allocation4], 0  ;;  %s848_s21 = smov [#allocation2]   ;;  %s800_s25 = scalar_lea.hbm %s1107_s1, 128 }
   0x2   :  { %s27_s22 = sshll.u32 %s848_s21, 4  ;;  %p801_p0 = scmp.ne.s32.totalorder %s1107_s1, %s800_s25  ;;  %s28_s22 = int_to_ptr.vmem [resolvable:$true] %s27_s22 }
   0x3   :  { %p804_p1 = scmp.lt.u32.totalorder %s800_s25, %s1107_s1 }
   0x5   :  { %p806_p2 = pnand %p804_p1, %p801_p0 }
   0x7   :  { %809 = shalt.err (!%p806_p2)
}
   0x8   :  { %s810_s30 = scalar_lea.vmem %s28_s22, 128  ;;  %p815_p4 = scmp.lt.s32.totalorder %s28_s22, %s28_s22 }
   0x9   :  { %p811_p3 = scmp.ne.s32.totalorder %s28_s22, %s810_s30  ;;  %p816_p5 = scmp.lt.s32.totalorder %s810_s30, %s810_s30 }
   0xb   :  { %p817_p6 = por %p816_p5, %p815_p4 }
   0xd   :  { %p818_p7 = pnand %p817_p6, %p811_p3 }
   0xf   :  { %821 = shalt.err (!%p818_p7)
}
  0x10   :  { %30 = dma.hbm_to_vmem [thread:$0]  %s1107_s1, 128, %s28_s22, [#allocation3]  }
  0x11   :  { %844 = dma.done.wait [#allocation3], 128  }
  0x12   :  { %845 = vsyncadd [#allocation3], 4294967168  ;;  %vm56_vm0 = vcmask 261120   ;;  %v55_v0 = vld [vmem:[%s1106_s0] sm:$0xff]  ;;  %v849_v8 = vmov 0.0   ;;  %vm850_vm1 = vmmov 0  }
  0x13   :  { %v57_v1 = vsel %vm56_vm0, %v55_v0, 0.0  ;;  %v742_v7 = vld [vmem:[%s1108_s2] sm:$0xff]   ;;  %696 = vmatprep.subr.bf16.mxu0 %v849_v8  ;;  %700 = vmatprep.mubr.msk.bf16.mxu0 %vm850_vm1, %v849_v8  ;;  %v743_v9 = vld [vmem:[%s1108_s2 + $0x8] sm:$0xff]   ;;  %v746_v12 = vld [vmem:[%s1110_s4 + $0x10] sm:$0xff]   ;;  %v851_v58 = vmov 0   ;;  %vm464_vm2 = vcmask 523264  }
  0x14   :  { %58 = vadd.xlane.f32.xlu0 %v57_v1  ;;  %697 = vmatpush3.bf16.msra.mxu0 %v742_v7  ;;  %v744_v10 = vld [vmem:[%s1110_s4] sm:$0xff]   ;;  %v745_v11 = vld [vmem:[%s1110_s4 + $0x8] sm:$0xff]   ;;  %v747_v13 = vld [vmem:[%s1110_s4 + $0x18] sm:$0xff]   ;;  %v272_v7 = vlaneseq  ;;  %s852_s24 = smov 64  }
  0x15   :  { %704 = vmatprep.subr.bf16.mxu1 %v849_v8  ;;  %698 = vmatprep.subr.bf16.mxu0 %v849_v8  ;;  %v748_v14 = vld [vmem:[%s1110_s4 + $0x20] sm:$0xff]   ;;  %v749_v15 = vld [vmem:[%s1110_s4 + $0x28] sm:$0xff]   ;;  %v750_v22 = vld [vmem:[%s1110_s4 + $0x30] sm:$0xff]  }
  0x16   :  { %720 = vmatprep.mubr.msk.bf16.mxu1 %vm850_vm1, %v849_v8  ;;  %705 = vmatpush3.bf16.msra.mxu1 %v744_v10  ;;  %v751_v23 = vld [vmem:[%s1110_s4 + $0x38] sm:$0xff]   ;;  %v752_v24 = vld [vmem:[%s1112_s6] ss:$8 sps:$4 sm:$0xff]   ;;  %v754_v25 = vld [vmem:[%s1112_s6 + $0x4] ss:$8 sps:$4 sm:$0xff]  }
  0x17   :  { %706 = vmatprep.subr.bf16.mxu1 %v849_v8  ;;  %v757_v26 = vld [vmem:[%s1112_s6 + $0x14] ss:$8 sps:$4 sm:$0xff]   ;;  %v755_v27 = vld [vmem:[%s1112_s6 + $0x10] ss:$8 sps:$4 sm:$0xff]   ;;  %v766_v28 = vld [vmem:[%s1114_s8 + $0x4] ss:$8 sps:$4 sm:$0xff]  }
  0x18   :  { %699 = vmatpush3.bf16.msra.mxu0 %v743_v9  ;;  %v760_v29 = vld [vmem:[%s1112_s6 + $0x24] ss:$8 sps:$4 sm:$0xff]   ;;  %v758_v30 = vld [vmem:[%s1112_s6 + $0x20] ss:$8 sps:$4 sm:$0xff]   ;;  %v763_v31 = vld [vmem:[%s1112_s6 + $0x34] ss:$8 sps:$4 sm:$0xff]  }
  0x19   :  { %362 = vmatprep.subr.bf16.mxu0 %v754_v25  ;;  %v761_v32 = vld [vmem:[%s1112_s6 + $0x30] ss:$8 sps:$4 sm:$0xff]   ;;  %v769_v33 = vld [vmem:[%s1112_s6 + $0x44] ss:$8 sps:$4 sm:$0xff]   ;;  %v767_v34 = vld [vmem:[%s1112_s6 + $0x40] ss:$8 sps:$4 sm:$0xff]  }
  0x1a   :  { %707 = vmatpush3.bf16.msra.mxu1 %v745_v11  ;;  %v775_v35 = vld [vmem:[%s1112_s6 + $0x54] ss:$8 sps:$4 sm:$0xff]   ;;  %v773_v36 = vld [vmem:[%s1112_s6 + $0x50] ss:$8 sps:$4 sm:$0xff]   ;;  %v781_v37 = vld [vmem:[%s1112_s6 + $0x64] ss:$8 sps:$4 sm:$0xff]  }
  0x1b   :  { %708 = vmatprep.subr.bf16.mxu1 %v849_v8  ;;  %v779_v38 = vld [vmem:[%s1112_s6 + $0x60] ss:$8 sps:$4 sm:$0xff]   ;;  %v772_v48 = vld [vmem:[%s1114_s8 + $0x14] ss:$8 sps:$4 sm:$0xff]   ;;  %v770_v49 = vld [vmem:[%s1114_s8 + $0x10] ss:$8 sps:$4 sm:$0xff]  }
  0x1c   :  { %v634_v39 = vld [vmem:[%s1109_s3] ss:$0 sm:$0xff]  ;;  %v778_v50 = vld [vmem:[%s1114_s8 + $0x24] ss:$8 sps:$4 sm:$0xff]   ;;  %v784_v52 = vld [vmem:[%s1114_s8 + $0x34] ss:$8 sps:$4 sm:$0xff]  }
  0x1d   :  { %v764_v46 = vld [vmem:[%s1114_s8] ss:$8 sps:$4 sm:$0xff]   ;;  %v782_v53 = vld [vmem:[%s1114_s8 + $0x30] ss:$8 sps:$4 sm:$0xff]   ;;  %v787_v54 = vld [vmem:[%s1112_s6 + $0x74] ss:$8 sps:$4 sm:$0xff]  }
  0x1e   :  { %709 = vmatpush3.bf16.msra.mxu1 %v746_v12  ;;  %v776_v51 = vld [vmem:[%s1114_s8 + $0x20] ss:$8 sps:$4 sm:$0xff]   ;;  %v785_v56 = vld [vmem:[%s1112_s6 + $0x70] ss:$8 sps:$4 sm:$0xff]   ;;  %v273_v9 = vshrl.u32 %v272_v7, 7 }
  0x1f   :  { %710 = vmatprep.subr.bf16.mxu1 %v849_v8  ;;  %v1053_v55 = vld [vmem:[#allocation2] sm:$0xff] }
  0x20   :  { %v403_v57 = vpack.c.bf16 %v1053_v55, %v1053_v55  ;;  %v638_v59 = vld [vmem:[%s1111_s5] ss:$0 sm:$0xff]  ;;  %v274_v10 = vsub.s32 0, %v273_v9  ;;  %v278_v25 = vsub.s32 1, %v273_v9 }
  0x21   :  { %v412_v11 = vld [vmem:[%s1115_s9] sm:$0x3] }
  0x22   :  { %711 = vmatpush3.bf16.msra.mxu1 %v747_v13  ;;  %v270_v12 = vld [vmem:[%s1113_s7] sm:$0x3]  ;;  %v417_v13 = vrot.slane %v412_v11, %v274_v10 }
  0x23   :  { %712 = vmatprep.subr.bf16.mxu1 %v849_v8 }
  0x26   :  { %713 = vmatpush3.bf16.msra.mxu1 %v748_v14  ;;  %v275_v14 = vrot.slane %v270_v12, %v274_v10 }
  0x27   :  { %714 = vmatprep.subr.bf16.mxu1 %v849_v8 }
  0x2a   :  { %715 = vmatpush3.bf16.msra.mxu1 %v749_v15 }
  0x2b   :  { %716 = vmatprep.subr.bf16.mxu1 %v849_v8 }
  0x2e   :  { %717 = vmatpush3.bf16.msra.mxu1 %v750_v22 }
  0x2f   :  { %718 = vmatprep.subr.bf16.mxu1 %v849_v8 }
  0x32   :  { %719 = vmatpush3.bf16.msra.mxu1 %v751_v23 }
  0x33   :  { %468 = vmatprep.subr.bf16.mxu1 %v766_v28 }
  0xa1   :  { %v59_v2 = vpop.xlane.xlu0 %58 }
  0xa2   :  { %v61_v3 = vmul.f32 0.03125, %v59_v2 }
  0xa4   :  { %v62_v4 = vsub.f32 %v55_v0, %v61_v3 }
  0xa6   :  { %v63_v5 = vmul.f32 %v62_v4, %v62_v4 }
  0xa8   :  { %v64_v6 = vsel %vm56_vm0, %v63_v5, 0.0 }
  0xa9   :  { %65 = vadd.xlane.f32.xlu0 %v64_v6 }
 0x136   :  { %v66_v16 = vpop.xlane.xlu0 %65 }
 0x137   :  { %v67_v17 = vmul.f32 0.03125, %v66_v16 }
 0x139   :  { %v68_v18 = vadd.f32 1e-05, %v67_v17 }
 0x13b   :  { %792 = vrsqrt.f32 %v68_v18 }
 0x145   :  { %v793_v19 = vpop.eup %792 }
 0x146   :  { %v70_v20 = vmul.f32 %v793_v19, %v62_v4 }
 0x148   :  { %v71_v21 = vpack.c.bf16 %v70_v20, %v70_v20 }
 0x14a   :  { %701 = vmatmul.mubr.msk.bf16.vlgmr.msra.gmra.mrb[0].mxu0 %vm56_vm0, %v71_v21 }
 0x14b   :  { %363 = vmatpush1.bf16.msra.mxu0 %v752_v24  ;;  %394 = vmatprep.mubr.bf16.mxu0 %v851_v58 }
 0x14c   :  { %364 = vmatprep.subr.bf16.mxu0 %v757_v26  ;;  %v421_v26 = vrot.slane %v412_v11, %v278_v25 }
 0x14f   :  { %365 = vmatpush1.bf16.msra.mxu0 %v755_v27  ;;  %v279_v27 = vrot.slane %v270_v12, %v278_v25 }
 0x150   :  { %366 = vmatprep.subr.bf16.mxu0 %v760_v29 }
 0x153   :  { %367 = vmatpush1.bf16.msra.mxu0 %v758_v30 }
 0x154   :  { %368 = vmatprep.subr.bf16.mxu0 %v763_v31 }
 0x157   :  { %369 = vmatpush1.bf16.msra.mxu0 %v761_v32 }
 0x158   :  { %370 = vmatprep.subr.bf16.mxu0 %v769_v33  ;;  %v788_v33 = vld [vmem:[%s1116_s10] sm:$0xff]  }
 0x15b   :  { %371 = vmatpush1.bf16.msra.mxu0 %v767_v34  ;;  %v789_v34 = vld [vmem:[%s1116_s10 + $0x8] sm:$0xff]  }
 0x15c   :  { %372 = vmatprep.subr.bf16.mxu0 %v775_v35  ;;  %v790_v35 = vld [vmem:[%s1116_s10 + $0x10] sm:$0xff]  }
 0x15f   :  { %373 = vmatpush1.bf16.msra.mxu0 %v773_v36 }
 0x160   :  { %374 = vmatprep.subr.bf16.mxu0 %v781_v37 }
 0x163   :  { %375 = vmatpush1.bf16.msra.mxu0 %v779_v38  ;;  %v791_v38 = vld [vmem:[%s1116_s10 + $0x18] sm:$0xff]   ;;  %s853_s10 = smov [#allocation5]  }
 0x164   :  { %376 = vmatprep.subr.bf16.mxu0 %v787_v54  ;;  %s625_s28 = sshll.u32 %s853_s10, 4  ;;  %s626_s28 = int_to_ptr.vmem [resolvable:$true] %s625_s28 }
 0x165   :  { %s822_s29 = scalar_lea.vmem %s626_s28, 128  ;;  %p827_p9 = scmp.lt.s32.totalorder %s626_s28, %s626_s28 }
 0x166   :  { %p823_p8 = scmp.ne.s32.totalorder %s626_s28, %s822_s29  ;;  %p828_p10 = scmp.lt.s32.totalorder %s822_s29, %s822_s29 }
 0x167   :  { %377 = vmatpush1.bf16.msra.mxu0 %v785_v56 }
 0x168   :  { %724 = vmatprep.subr.bf16.mxu0 %v849_v8  ;;  %p829_p11 = por %p828_p10, %p827_p9 }
 0x16a   :  { %p830_p12 = pnand %p829_p11, %p823_p8 }
 0x21d   :  { %v132_v40 = vpop.f32.mrb[0].mxu0 }
 0x21e   :  { %v133_v41 = vadd.f32 %v634_v39, %v132_v40  ;;  %v702_v42 = vpop.f32.mrb[1].mxu0 }
 0x21f   :  { %v135_v43 = vpop.f32.mrb[2].mxu0 }
 0x220   :  { %v138_v44 = vmax.f32 %v133_v41, 0.0  ;;  %v703_v45 = vpop.f32.mrb[3].mxu0 }
 0x222   :  { %v139_v47 = vpack.c.bf16 %v138_v44, %v138_v44  ;;  %v673_v44 = vld [vmem:[%s1117_s11] ss:$0 sm:$0xff] }
 0x224   :  { %721 = vmatmul.mubr.bf16.vlgmr.msra.gmra.mrb[0].mxu1 %v139_v47 }
 0x225   :  { %469 = vmatpush1.bf16.msra.mxu1 %v764_v46  ;;  %500 = vmatprep.mubr.bf16.mxu1 %v851_v58 }
 0x226   :  { %470 = vmatprep.subr.bf16.mxu1 %v772_v48 }
 0x229   :  { %471 = vmatpush1.bf16.msra.mxu1 %v770_v49 }
 0x22a   :  { %472 = vmatprep.subr.bf16.mxu1 %v778_v50 }
 0x22d   :  { %473 = vmatpush1.bf16.msra.mxu1 %v776_v51 }
 0x22e   :  { %474 = vmatprep.subr.bf16.mxu1 %v784_v52 }
 0x231   :  { %475 = vmatpush1.bf16.msra.mxu1 %v782_v53 }
 0x234   :  { %671 = vmatmul.mubr.msk.bf16.vlgmr.msra.gmra.mrb[4].mxu1 %vm464_vm2, %v403_v57 }
 0x2f7   :  { %v245_v60 = vpop.f32.mrb[0].mxu1 }
 0x2f8   :  { %v246_v61 = vadd.f32 %v638_v59, %v245_v60  ;;  %v722_v62 = vpop.f32.mrb[1].mxu1 }
 0x2f9   :  { %v248_v63 = vpop.f32.mrb[2].mxu1 }
 0x2fa   :  { %v251_v0 = vmax.f32 %v246_v61, 0.0  ;;  %v723_v1 = vpop.f32.mrb[3].mxu1 }
 0x2fc   :  { %v253_v2 = vpack.c.bf16 %v251_v0, %v251_v0 }
 0x2fe   :  { %395 = vmatmul.mubr.bf16.vlgmr.msra.gmra.mrb[4].mxu0 %v253_v2 }
 0x2ff   :  { %732 = vmatprep.mubr.msk.bf16.mxu0 %vm850_vm1, %v849_v8  ;;  %725 = vmatpush3.bf16.msra.mxu0 %v788_v33 }
 0x300   :  { %726 = vmatprep.subr.bf16.mxu0 %v849_v8 }
 0x303   :  { %727 = vmatpush3.bf16.msra.mxu0 %v789_v34 }
 0x304   :  { %728 = vmatprep.subr.bf16.mxu0 %v849_v8 }
 0x307   :  { %v502_v3 = vpop.f32.mrb[4].mxu1  ;;  %729 = vmatpush3.bf16.msra.mxu0 %v790_v35 }
 0x308   :  { %v504_v4 = vpop.f32.mrb[5].mxu1  ;;  %v503_v15 = vadd.f32 %v502_v3, %v417_v13  ;;  %730 = vmatprep.subr.bf16.mxu0 %v849_v8 }
 0x309   :  { %v506_v5 = vpop.f32.mrb[6].mxu1  ;;  %v505_v28 = vadd.f32 %v504_v4, %v421_v26 }
 0x30a   :  { %v507_v6 = vpop.f32.mrb[7].mxu1 }
 0x30b   :  { %731 = vmatpush3.bf16.msra.mxu0 %v791_v38 }
 0x3d1   :  { %v396_v16 = vpop.f32.mrb[4].mxu0 }
 0x3d2   :  { %v397_v17 = vadd.f32 %v396_v16, %v275_v14  ;;  %v398_v18 = vpop.f32.mrb[5].mxu0 }
 0x3d3   :  { %v400_v19 = vpop.f32.mrb[6].mxu0  ;;  %v399_v30 = vadd.f32 %v398_v18, %v279_v27 }
 0x3d4   :  { %v509_v20 = vadd.f32 %v503_v15, %v397_v17  ;;  %v401_v21 = vpop.f32.mrb[7].mxu0 }
 0x3d6   :  { %v672_v22 = vmul.f32 -1.442695, %v509_v20 }
 0x3d8   :  { %794 = vpow2.f32 %v672_v22 }
 0x3e2   :  { %v795_v23 = vpop.eup %794 }
 0x3e3   :  { %v513_v24 = vadd.f32 1.0, %v795_v23 }
 0x3e5   :  { %796 = vrcp.f32 %v513_v24 }
 0x3ef   :  { %v797_v29 = vpop.eup %796 }
 0x3f0   :  { %v516_v31 = vmul.f32 %v797_v29, %v505_v28 }
 0x3f2   :  { %v517_v32 = vadd.f32 %v516_v31, %v399_v30 }
 0x3f4   :  { %798 = vtanh.f32 %v517_v32 }
 0x3fe   :  { %v799_v36 = vpop.eup %798 }
 0x3ff   :  { %v519_v37 = vsub.f32 %v1053_v55, %v799_v36 }
 0x401   :  { %521 = vrot.lane.b32.xlu1 %v519_v37, %s852_s24 }
 0x473   :  { %v522_v39 = vpop.permute.xlu1 %521 }
 0x474   :  { %v524_v40 = vmul.f32 %v797_v29, %v522_v39 }
 0x476   :  { %526 = vrot.lane.b32.xlu1 %v524_v40, %s852_s24 }
 0x4e8   :  { %v527_v41 = vpop.permute.xlu1 %526 }
 0x4e9   :  { %v529_v42 = vadd.f32 %v799_v36, %v527_v41 }
 0x4eb   :  { %v530_v43 = vpack.c.bf16 %v529_v42, %v529_v42 }
 0x4ed   :  { %733 = vmatmul.mubr.msk.bf16.vlgmr.msra.gmra.mrb[8].mxu0 %vm464_vm2, %v530_v43 }
 0x5c0   :  { %v607_v45 = vpop.f32.mrb[8].mxu0 }
 0x5c1   :  { %v608_v46 = vadd.f32 %v673_v44, %v607_v45  ;;  %v734_v8 = vpop.f32.mrb[9].mxu0 }
 0x5c2   :  { %v610_v47 = vpop.f32.mrb[10].mxu0 }
 0x5c3   :  { %614 = vrot.lane.b32.xlu0 %v608_v46, %s852_s24  ;;  %v735_v48 = vpop.f32.mrb[11].mxu0 }
 0x635   :  { %v615_v49 = vpop.permute.xlu0 %614 }
 0x636   :  { %v617_v50 = vsel %vm464_vm2, %v529_v42, %v615_v49 }
 0x637   :  { %618 = vst [vmem:[#allocation5] sm:$0xff] %v617_v50 }
 0x638   :  { %833 = shalt.err (!%p830_p12)
}
 0x639   :  { %s834_s13 = scalar_lea.hbm %s1118_s12, 128 }
 0x63a   :  { %p835_p13 = scmp.ne.s32.totalorder %s1118_s12, %s834_s13  ;;  %p838_p0 = scmp.lt.u32.totalorder %s834_s13, %s1118_s12 }
 0x63c   :  { %p840_p1 = pnand %p838_p0, %p835_p13 }
 0x63e   :  { %843 = shalt.err (!%p840_p1)
}
 0x63f   :  { %628 = dma.vmem_to_hbm [thread:$0]  %s626_s28, 128, %s1118_s12, [#allocation4]  }
 0x640   :  { %846 = dma.done.wait [#allocation4], 128  }
 0x641   :  { %847 = vsyncadd [#allocation4], 4294967168 }
 0x642   :  { %632 = vsyncpa [#allocation3], 1 }
 0x643   :  { %633 = vsyncpa [#allocation4], 1 }

</bundles_post_ra>
